<compile_context>
chip_gen: v7x
topology: tpu7x:2x2x1
jax: 0.10.0
libtpu: 0.0.40
codegen_flags: <defaults>
</compile_context>

<pallas_src>
import functools

import jax
import jax.numpy as jnp
from jax import lax
from jax.experimental import pallas as pl
from jax.experimental.pallas import tpu as pltpu

LANES = 128
SUBLANES = 8


def _focal_loss_kernel(
    x_ref, t_ref, o_ref, *, gamma, block_rows, full_rows, rem_lanes, needs_mask
):
    x = x_ref[...].astype(jnp.float32)
    t = t_ref[...].astype(jnp.float32)

    # Numerically-stable BCE-with-logits, identical to the PyTorch expression:
    #   x - x*t + max(-x,0) + log(exp(-max(-x,0)) + exp(-x-max(-x,0)))
    #   == max(x,0) - x*t + log1p(exp(-|x|))
    loss = jnp.maximum(x, 0.0) - x * t + jnp.log1p(jnp.exp(-jnp.abs(x)))

    # invprobs = logsigmoid(-x*(2t-1)) = min(z,0) - log1p(exp(-|z|)), z = x*(1-2t).
    # (For hard {0,1} targets |z| == |x| and the log1p could be shared with the
    #  BCE term; kept separate so soft targets remain bit-exact with PyTorch.)
    z = x * (1.0 - 2.0 * t)
    invprobs = jnp.minimum(z, 0.0) - jnp.log1p(jnp.exp(-jnp.abs(z)))

    loss = jnp.exp(invprobs * gamma) * loss

    def _partial(v):
        # (block_rows,128) -> (block_rows/8, 8, 128), VPU-only adds over axis 0.
        return v.reshape(block_rows // SUBLANES, SUBLANES, LANES).sum(axis=0)

    if needs_mask:
        i = pl.program_id(0)
        last = pl.num_programs(0) - 1

        @pl.when(i != last)
        def _():
            o_ref[...] = _partial(loss)

        @pl.when(i == last)
        def _():
            # Mask garbage rows of the partial block and the padded tail lanes.
            grow = i * block_rows + lax.broadcasted_iota(jnp.int32, loss.shape, 0)
            lane = lax.broadcasted_iota(jnp.int32, loss.shape, 1)
            valid = jnp.logical_or(
                grow < full_rows,
                jnp.logical_and(grow == full_rows, lane < rem_lanes),
            )
            o_ref[...] = _partial(jnp.where(valid, loss, 0.0))

    else:
        o_ref[...] = _partial(loss)


def focal_loss(x, target, gamma, *, block_rows=1024):
    """Pallas implementation of FocalLoss(gamma)(x, target) -> scalar mean loss."""
    if x.shape != target.shape:
        raise ValueError(
            "Target size ({}) must be the same as input size ({})".format(
                target.shape, x.shape
            )
        )

    n = x.size
    tile = LANES * SUBLANES

    # Free, layout-preserving flatten; inputs stay in their native dtype.
    xf = x.reshape(-1)
    tf = target.reshape(-1)
    if n % tile != 0:
        # Only for ragged sizes: pad to a whole (8,128) tile (padded region is
        # masked out inside the kernel).
        pad = tile - n % tile
        xf = jnp.pad(xf, (0, pad))
        tf = jnp.pad(tf, (0, pad))

    rows = xf.size // LANES
    xf = xf.reshape(rows, LANES)
    tf = tf.reshape(rows, LANES)

    # Block rows: big tile (fits all generations: 2 inputs x 2 buffers x 512 KiB
    # at the default), clamped to the array and kept a multiple of 8.
    br = max(SUBLANES, (min(int(block_rows), rows) // SUBLANES) * SUBLANES)
    n_blocks = pl.cdiv(rows, br)

    full_rows = n // LANES
    rem_lanes = n % LANES
    needs_mask = (n_blocks * br * LANES) != n

    kernel = functools.partial(
        _focal_loss_kernel,
        gamma=float(gamma),
        block_rows=br,
        full_rows=full_rows,
        rem_lanes=rem_lanes,
        needs_mask=needs_mask,
    )

    out_rows = n_blocks * SUBLANES
    partials = pl.pallas_call(
        kernel,
        out_shape=jax.ShapeDtypeStruct((out_rows, LANES), jnp.float32),
        grid=(n_blocks,),
        in_specs=[
            pl.BlockSpec((br, LANES), lambda i: (i, 0)),
            pl.BlockSpec((br, LANES), lambda i: (i, 0)),
        ],
        out_specs=pl.BlockSpec((SUBLANES, LANES), lambda i: (i, 0)),
        compiler_params=pltpu.CompilerParams(
            dimension_semantics=("parallel",),
        ),
        cost_estimate=pl.CostEstimate(
            flops=15 * n,
            transcendentals=5 * n,
            bytes_accessed=x.nbytes + target.nbytes + out_rows * LANES * 4,
        ),
    )(xf, tf)

    # Tiny (n_blocks*8, 128) final reduce + mean in the wrapper.
    return jnp.sum(partials) / n


def _focal_loss_ref(x, target, gamma):
    """Pure-JAX reference mirroring the PyTorch forward exactly."""
    x = x.astype(jnp.float32)
    t = target.astype(jnp.float32)
    max_val = jnp.maximum(-x, 0.0)
    loss = x - x * t + max_val + jnp.log(jnp.exp(-max_val) + jnp.exp(-x - max_val))
    z = -x * (t * 2.0 - 1.0)
    invprobs = jnp.minimum(z, 0.0) - jnp.log1p(jnp.exp(-jnp.abs(z)))
    loss = jnp.exp(invprobs * gamma) * loss
    return jnp.mean(loss)


if __name__ == "__main__":
    key = jax.random.PRNGKey(0)
    k_x, k_t = jax.random.split(key)
    gamma = 2.0

    # NCHW logits and {0,1} targets of the same shape (as the module requires).
    x = jax.random.normal(k_x, (2, 4, 16, 16), dtype=jnp.float32)
    target = jax.random.bernoulli(k_t, p=0.5, shape=(2, 4, 16, 16)).astype(jnp.float32)
    out = jax.block_until_ready(focal_loss(x, target, gamma))
    ref = jax.block_until_ready(_focal_loss_ref(x, target, gamma))
    assert jnp.allclose(out, ref, rtol=1e-5, atol=1e-6), (out, ref)

    # Ragged size (exercises the tail mask path).
    x2 = jax.random.normal(k_x, (2, 3, 5, 7), dtype=jnp.float32)
    t2 = jax.random.bernoulli(k_t, p=0.5, shape=(2, 3, 5, 7)).astype(jnp.float32)
    out2 = jax.block_until_ready(focal_loss(x2, t2, gamma))
    ref2 = jax.block_until_ready(_focal_loss_ref(x2, t2, gamma))
    assert jnp.allclose(out2, ref2, rtol=1e-5, atol=1e-6), (out2, ref2)

    # Multi-block grid (exercises the parallel tiling path).
    x3 = jax.random.normal(k_x, (2, 4, 32, 32), dtype=jnp.float32)
    t3 = jax.random.bernoulli(k_t, p=0.5, shape=(2, 4, 32, 32)).astype(jnp.float32)
    out3 = jax.block_until_ready(focal_loss(x3, t3, gamma, block_rows=8))
    ref3 = jax.block_until_ready(_focal_loss_ref(x3, t3, gamma))
    assert jnp.allclose(out3, ref3, rtol=1e-5, atol=1e-6), (out3, ref3)

    print("KERNEL_OK")
</pallas_src>

<mosaic_0001>
module attributes {stable_mosaic.version = 11 : i64} {
  func.func @_focal_loss_kernel(%arg0: i32, %arg1: memref<16x128xf32, #tpu.memory_space<vmem>>, %arg2: memref<16x128xf32, #tpu.memory_space<vmem>>, %arg3: memref<8x128xf32, #tpu.memory_space<vmem>>) attributes {dimension_semantics = [#tpu.dimension_semantics<parallel>], iteration_bounds = array<i64: 1>, scalar_prefetch = 0 : i64, scratch_operands = 0 : i64, tpu.core_type = #tpu.core_type<tc>, window_params = [{transform_indices = @transform_0, window_bounds = array<i64: 16, 128>}, {transform_indices = @transform_1, window_bounds = array<i64: 16, 128>}, {transform_indices = @transform_2, window_bounds = array<i64: 8, 128>}]} {
    %c0 = arith.constant 0 : index
    %c0_0 = arith.constant 0 : index
    %0 = vector.load %arg1[%c0, %c0_0] : memref<16x128xf32, #tpu.memory_space<vmem>>, vector<16x128xf32>
    %c0_1 = arith.constant 0 : index
    %c0_2 = arith.constant 0 : index
    %1 = vector.load %arg2[%c0_1, %c0_2] : memref<16x128xf32, #tpu.memory_space<vmem>>, vector<16x128xf32>
    %cst = arith.constant 0.000000e+00 : f32
    %2 = vector.broadcast %cst : f32 to vector<16x128xf32>
    %3 = arith.maximumf %0, %2 : vector<16x128xf32>
    %4 = arith.mulf %0, %1 : vector<16x128xf32>
    %5 = arith.subf %3, %4 : vector<16x128xf32>
    %6 = math.absf %0 : vector<16x128xf32>
    %cst_3 = arith.constant 0.000000e+00 : f32
    %7 = vector.broadcast %cst_3 : f32 to vector<16x128xf32>
    %8 = arith.subf %7, %6 : vector<16x128xf32>
    %9 = math.exp %8 : vector<16x128xf32>
    %10 = math.log1p %9 : vector<16x128xf32>
    %11 = arith.addf %5, %10 : vector<16x128xf32>
    %cst_4 = arith.constant 2.000000e+00 : f32
    %12 = vector.broadcast %cst_4 : f32 to vector<16x128xf32>
    %13 = arith.mulf %12, %1 : vector<16x128xf32>
    %cst_5 = arith.constant 1.000000e+00 : f32
    %14 = vector.broadcast %cst_5 : f32 to vector<16x128xf32>
    %15 = arith.subf %14, %13 : vector<16x128xf32>
    %16 = arith.mulf %0, %15 : vector<16x128xf32>
    %cst_6 = arith.constant 0.000000e+00 : f32
    %17 = vector.broadcast %cst_6 : f32 to vector<16x128xf32>
    %18 = arith.minimumf %16, %17 : vector<16x128xf32>
    %19 = math.absf %16 : vector<16x128xf32>
    %cst_7 = arith.constant 0.000000e+00 : f32
    %20 = vector.broadcast %cst_7 : f32 to vector<16x128xf32>
    %21 = arith.subf %20, %19 : vector<16x128xf32>
    %22 = math.exp %21 : vector<16x128xf32>
    %23 = math.log1p %22 : vector<16x128xf32>
    %24 = arith.subf %18, %23 : vector<16x128xf32>
    %cst_8 = arith.constant 2.000000e+00 : f32
    %25 = vector.broadcast %cst_8 : f32 to vector<16x128xf32>
    %26 = arith.mulf %24, %25 : vector<16x128xf32>
    %27 = math.exp %26 : vector<16x128xf32>
    %28 = arith.mulf %27, %11 : vector<16x128xf32>
    %29 = vector.shape_cast %28 : vector<16x128xf32> to vector<2x8x128xf32>
    %cst_9 = arith.constant dense<0.000000e+00> : vector<8x128xf32>
    %30 = vector.multi_reduction <add>, %29, %cst_9 [0] : vector<2x8x128xf32> to vector<8x128xf32>
    %c0_10 = arith.constant 0 : index
    %c0_11 = arith.constant 0 : index
    %31 = vector.load %arg3[%c0_10, %c0_11] : memref<8x128xf32, #tpu.memory_space<vmem>>, vector<8x128xf32>
    tpu.vector_store %arg3[%c0_10, %c0_11], %30 {strides = array<i32>} : memref<8x128xf32, #tpu.memory_space<vmem>>, vector<8x128xf32>,
    return
  }
  func.func @transform_0(%arg0: i32) -> (i32, i32) {
    %c0_i32 = arith.constant 0 : i32
    %c0_i32_0 = arith.constant 0 : i32
    return %arg0, %c0_i32 : i32, i32
  }
  func.func @transform_1(%arg0: i32) -> (i32, i32) {
    %c0_i32 = arith.constant 0 : i32
    %c0_i32_0 = arith.constant 0 : i32
    return %arg0, %c0_i32 : i32, i32
  }
  func.func @transform_2(%arg0: i32) -> (i32, i32) {
    %c0_i32 = arith.constant 0 : i32
    %c0_i32_0 = arith.constant 0 : i32
    return %arg0, %c0_i32 : i32, i32
  }
}

</mosaic_0001>

<bundles_post_ra>
// kernel: tpu_custom_call.1
= control target key start
LH: loop header
LB: loop body
LE: loop exit
PB: predicated region body
PF: predicated region fallthrough
CT: control target
= control target key end

     0   :  { %7 = vsyncpa [#allocation3], 0  ;;  %s313_s0 = inlined_call_operand.hbm [shape: f32[16,128], index: 0, kind: input, shape index: {}]   ;;  %s314_s1 = inlined_call_operand.hbm [shape: f32[16,128], index: 1, kind: input, shape index: {}]   ;;  %s315_s2 = inlined_call_operand.hbm [shape: f32[8,128], index: 2, kind: output, shape index: {}]  }
   0x1   :  { %8 = vsyncpa [#allocation6], 0 }
   0x2   :  { %9 = vsyncpa [#allocation4], 0  ;;  %s237_s9 = smov [#allocation2]   ;;  %s165_s13 = scalar_lea.hbm %s313_s0, 256 }
   0x3   :  { %s15_s10 = sshll.u32 %s237_s9, 4  ;;  %p166_p0 = scmp.ne.s32.totalorder %s313_s0, %s165_s13  ;;  %s16_s10 = int_to_ptr.vmem [resolvable:$true] %s15_s10 }
   0x4   :  { %p169_p1 = scmp.lt.u32.totalorder %s165_s13, %s313_s0 }
   0x6   :  { %p171_p2 = pnand %p169_p1, %p166_p0 }
   0x8   :  { %174 = shalt.err (!%p171_p2)
}
   0x9   :  { %s175_s18 = scalar_lea.vmem %s16_s10, 256  ;;  %p180_p4 = scmp.lt.s32.totalorder %s16_s10, %s16_s10 }
   0xa   :  { %p176_p3 = scmp.ne.s32.totalorder %s16_s10, %s175_s18  ;;  %p181_p5 = scmp.lt.s32.totalorder %s175_s18, %s175_s18 }
   0xc   :  { %p182_p6 = por %p181_p5, %p180_p4 }
   0xe   :  { %p183_p7 = pnand %p182_p6, %p176_p3 }
  0x10   :  { %186 = shalt.err (!%p183_p7)
}
  0x11   :  { %s238_s19 = smov 128   ;;  %s239_s20 = smov 8  }
  0x12   :  { %21 = dma.hbm_to_vmem [thread:$0]  %s313_s0, 256, %s16_s10, [#allocation3], %s238_s19, %s238_s19, %s239_s20  }
  0x13   :  { %s240_s23 = smov [#allocation5]   ;;  %s187_s27 = scalar_lea.hbm %s314_s1, 256 }
  0x14   :  { %s27_s24 = sshll.u32 %s240_s23, 4  ;;  %p188_p8 = scmp.ne.s32.totalorder %s314_s1, %s187_s27  ;;  %s28_s24 = int_to_ptr.vmem [resolvable:$true] %s27_s24 }
  0x15   :  { %p191_p9 = scmp.lt.u32.totalorder %s187_s27, %s314_s1 }
  0x17   :  { %p193_p10 = pnand %p191_p9, %p188_p8 }
  0x19   :  { %196 = shalt.err (!%p193_p10)
}
  0x1a   :  { %s197_s4 = scalar_lea.vmem %s28_s24, 256  ;;  %p202_p12 = scmp.lt.s32.totalorder %s28_s24, %s28_s24 }
  0x1b   :  { %p198_p11 = scmp.ne.s32.totalorder %s28_s24, %s197_s4  ;;  %p203_p13 = scmp.lt.s32.totalorder %s197_s4, %s197_s4 }
  0x1d   :  { %p204_p0 = por %p203_p13, %p202_p12 }
  0x1f   :  { %p205_p1 = pnand %p204_p0, %p198_p11 }
  0x21   :  { %208 = shalt.err (!%p205_p1)
}
  0x22   :  { %33 = dma.hbm_to_vmem [thread:$0]  %s314_s1, 256, %s28_s24, [#allocation6], %s238_s19, %s238_s19, %s239_s20  }
  0x23   :  { %231 = dma.done.wait [#allocation3], 256  }
  0x24   :  { %232 = vsyncadd [#allocation3], 4294967040 }
  0x25   :  { %233 = dma.done.wait [#allocation6], 256  }
  0x26   :  { %234 = vsyncadd [#allocation6], 4294967040  ;;  %v281_v0 = vld [vmem:[#allocation5] sm:$0xff]  ;;  %v283_v1 = vld [vmem:[#allocation5 + $0x8] sm:$0xff]  ;;  %s241_s1 = smov [#allocation7]  }
  0x27   :  { %v78_v2 = vmul.f32 2.0, %v281_v0  ;;  %v79_v3 = vmul.f32 2.0, %v283_v1  ;;  %v287_v4 = vld [vmem:[#allocation2] sm:$0xff]  ;;  %v289_v5 = vld [vmem:[#allocation2 + $0x8] sm:$0xff]  ;;  %s130_s6 = sshll.u32 %s241_s1, 4  ;;  %s131_s6 = int_to_ptr.vmem [resolvable:$true] %s130_s6 }
  0x28   :  { %v50_v8 = vand.u32 2147483647, %v287_v4  ;;  %v51_v9 = vand.u32 2147483647, %v289_v5  ;;  %v44_v59 = vmax.f32 %v287_v4, 0.0  ;;  %v45_v60 = vmax.f32 %v289_v5, 0.0  ;;  %p214_p3 = scmp.lt.s32.totalorder %s131_s6, %s131_s6 }
  0x29   :  { %v80_v6 = vsub.f32 1.0, %v78_v2  ;;  %v81_v7 = vsub.f32 1.0, %v79_v3  ;;  %v46_v61 = vmul.f32 %v281_v0, %v287_v4  ;;  %v47_v63 = vmul.f32 %v283_v1, %v289_v5  ;;  %s209_s7 = scalar_lea.vmem %s131_s6, 128 }
  0x2a   :  { %v52_v13 = vsub.f32 0.0, %v50_v8  ;;  %v53_v15 = vsub.f32 0.0, %v51_v9  ;;  %p210_p2 = scmp.ne.s32.totalorder %s131_s6, %s209_s7  ;;  %p215_p4 = scmp.lt.s32.totalorder %s209_s7, %s209_s7 }
  0x2b   :  { %v82_v10 = vmul.f32 %v80_v6, %v287_v4  ;;  %v83_v11 = vmul.f32 %v81_v7, %v289_v5  ;;  %v48_v8 = vsub.f32 %v44_v59, %v46_v61  ;;  %v49_v9 = vsub.f32 %v45_v60, %v47_v63 }
  0x2c   :  { %v54_v19 = vmul.f32 1.442695, %v52_v13  ;;  %v56_v21 = vmul.f32 1.442695, %v53_v15  ;;  %p216_p5 = por %p215_p4, %p214_p3 }
  0x2d   :  { %v86_v12 = vand.u32 2147483647, %v82_v10  ;;  %v87_v14 = vand.u32 2147483647, %v83_v11  ;;  %v84_v38 = vmin.f32 %v82_v10, 0.0  ;;  %v85_v41 = vmin.f32 %v83_v11, 0.0 }
  0x2e   :  { %p217_p6 = pnand %p216_p5, %p210_p2 }
  0x2f   :  { %v88_v16 = vsub.f32 0.0, %v86_v12  ;;  %v89_v17 = vsub.f32 0.0, %v87_v14 }
  0x31   :  { %v90_v18 = vmul.f32 1.442695, %v88_v16  ;;  %v92_v20 = vmul.f32 1.442695, %v89_v17 }
  0x33   :  { %145 = vpow2.f32 %v90_v18 }
  0x34   :  { %147 = vpow2.f32 %v92_v20 }
  0x35   :  { %149 = vpow2.f32 %v54_v19 }
  0x36   :  { %151 = vpow2.f32 %v56_v21 }
  0x3d   :  { %v146_v22 = vpop.eup %145 }
  0x3e   :  { %v148_v23 = vpop.eup %147  ;;  %v94_v24 = vadd.f32 1.0, %v146_v22  ;;  %v97_v28 = vmul.f32 -0.5, %v146_v22  ;;  %v100_v33 = vand.u32 2147483647, %v146_v22 }
  0x3f   :  { %v103_v25 = vadd.f32 1.0, %v148_v23  ;;  %v150_v26 = vpop.eup %149  ;;  %v106_v29 = vmul.f32 -0.5, %v148_v23  ;;  %v109_v35 = vand.u32 2147483647, %v148_v23 }
  0x40   :  { %153 = vlog2.f32 %v94_v24  ;;  %v152_v27 = vpop.eup %151  ;;  %v58_v30 = vadd.f32 1.0, %v150_v26  ;;  %v98_v32 = vadd.f32 1.0, %v97_v28  ;;  %vm101_vm0 = vcmp.lt.f32.partialorder %v100_v33, 0.0004427343 }
  0x41   :  { %155 = vlog2.f32 %v103_v25  ;;  %v67_v31 = vadd.f32 1.0, %v152_v27  ;;  %v107_v34 = vadd.f32 1.0, %v106_v29  ;;  %vm110_vm1 = vcmp.lt.f32.partialorder %v109_v35, 0.0004427343 }
  0x42   :  { %157 = vlog2.f32 %v58_v30  ;;  %v99_v36 = vmul.f32 %v146_v22, %v98_v32  ;;  %v61_v43 = vmul.f32 -0.5, %v150_v26  ;;  %v70_v45 = vmul.f32 -0.5, %v152_v27 }
  0x43   :  { %159 = vlog2.f32 %v67_v31  ;;  %v108_v39 = vmul.f32 %v148_v23, %v107_v34  ;;  %v64_v53 = vand.u32 2147483647, %v150_v26  ;;  %v73_v57 = vand.u32 2147483647, %v152_v27 }
  0x44   :  { %v62_v50 = vadd.f32 1.0, %v61_v43  ;;  %v71_v54 = vadd.f32 1.0, %v70_v45 }
  0x45   :  { %vm65_vm2 = vcmp.lt.f32.partialorder %v64_v53, 0.0004427343  ;;  %vm74_vm3 = vcmp.lt.f32.partialorder %v73_v57, 0.0004427343 }
  0x46   :  { %v63_v3 = vmul.f32 %v150_v26, %v62_v50  ;;  %v72_v7 = vmul.f32 %v152_v27, %v71_v54 }
  0x4a   :  { %v154_v37 = vpop.eup %153 }
  0x4b   :  { %v156_v40 = vpop.eup %155  ;;  %v96_v42 = vmul.f32 0.6931472, %v154_v37 }
  0x4c   :  { %v105_v44 = vmul.f32 0.6931472, %v156_v40  ;;  %v158_v52 = vpop.eup %157 }
  0x4d   :  { %v102_v46 = vsel %vm101_vm0, %v99_v36, %v96_v42  ;;  %v160_v56 = vpop.eup %159  ;;  %v60_v2 = vmul.f32 0.6931472, %v158_v52 }
  0x4e   :  { %v111_v47 = vsel %vm110_vm1, %v108_v39, %v105_v44  ;;  %v112_v48 = vsub.f32 %v84_v38, %v102_v46  ;;  %v69_v6 = vmul.f32 0.6931472, %v160_v56 }
  0x4f   :  { %v113_v49 = vsub.f32 %v85_v41, %v111_v47  ;;  %v66_v10 = vsel %vm65_vm2, %v63_v3, %v60_v2 }
  0x50   :  { %v114_v51 = vmul.f32 2.0, %v112_v48  ;;  %v75_v11 = vsel %vm74_vm3, %v72_v7, %v69_v6  ;;  %v76_v12 = vadd.f32 %v66_v10, %v48_v8 }
  0x51   :  { %v115_v55 = vmul.f32 2.0, %v113_v49  ;;  %v77_v13 = vadd.f32 %v75_v11, %v49_v9 }
  0x52   :  { %v116_v58 = vmul.f32 1.442695, %v114_v51 }
  0x53   :  { %v118_v62 = vmul.f32 1.442695, %v115_v55 }
  0x54   :  { %161 = vpow2.f32 %v116_v58 }
  0x55   :  { %163 = vpow2.f32 %v118_v62 }
  0x5e   :  { %v162_v14 = vpop.eup %161 }
  0x5f   :  { %v164_v0 = vpop.eup %163  ;;  %v120_v4 = vmul.f32 %v162_v14, %v76_v12 }
  0x60   :  { %v121_v1 = vmul.f32 %v164_v0, %v77_v13 }
  0x62   :  { %v122_v5 = vadd.f32 %v121_v1, %v120_v4 }
  0x64   :  { %123 = vst [vmem:[#allocation7] sm:$0xff] %v122_v5 }
  0x65   :  { %220 = shalt.err (!%p217_p6)
}
  0x66   :  { %s221_s10 = scalar_lea.hbm %s315_s2, 128 }
  0x67   :  { %p222_p7 = scmp.ne.s32.totalorder %s315_s2, %s221_s10  ;;  %p225_p8 = scmp.lt.u32.totalorder %s221_s10, %s315_s2 }
  0x69   :  { %p227_p9 = pnand %p225_p8, %p222_p7 }
  0x6b   :  { %230 = shalt.err (!%p227_p9)
}
  0x6c   :  { %133 = dma.vmem_to_hbm [thread:$0]  %s131_s6, 128, %s315_s2, [#allocation4]  }
  0x6d   :  { %235 = dma.done.wait [#allocation4], 128  }
  0x6e   :  { %236 = vsyncadd [#allocation4], 4294967168 }
  0x6f   :  { %137 = vsyncpa [#allocation3], 1 }
  0x70   :  { %138 = vsyncpa [#allocation6], 1 }
  0x71   :  { %139 = vsyncpa [#allocation4], 1 }

</bundles_post_ra>
